<compile_context>
chip_gen: v7x
topology: tpu7x:2x2x1
jax: 0.10.0
libtpu: 0.0.40
codegen_flags: <defaults>
</compile_context>

<pallas_src>
import jax
import jax.numpy as jnp
from jax.experimental import pallas as pl
from jax.experimental.pallas import tpu as pltpu

BETA = 0.9
THRESHOLD = 1.0


def _snn_chunk_kernel(x_ref, w_ref, b_ref, spk_ref, mem_ref, mem_state):
    # grid = (B // TB, T // Tc); batch axis parallel, time-chunk axis sequential.
    t_chunk = pl.program_id(1)

    # utils.reset(self.architecture): zero the carried membrane at the first time
    # chunk of every batch tile (time is the inner, sequential grid axis).
    @pl.when(t_chunk == 0)
    def _():
        mem_state[...] = jnp.zeros_like(mem_state)

    Tc, TB, F = x_ref.shape
    H = w_ref.shape[1]

    # Hoisted Linear: one bf16 MXU matmul for the whole chunk, f32 accumulate.
    # Bias is NOT added here (that would be an extra full RMW pass over cur_all);
    # it is folded into the recurrence below instead.
    x_all = x_ref[...].reshape(Tc * TB, F)
    cur_all = jnp.dot(x_all, w_ref[...], preferred_element_type=jnp.float32)

    # Hoisted bias broadcast (never re-broadcast inside the loop).
    b_row = jnp.broadcast_to(b_ref[...], (TB, H)).astype(jnp.float32)

    mem = mem_state[...]  # (TB, H) f32 carry

    def lif_step(i, mem, cur):
        mem = BETA * mem + cur + b_row
        pred = mem > THRESHOLD
        spk_ref[i] = pred.astype(spk_ref.dtype)       # bf16 store; 0/1 is exact
        mem_ref[i] = mem.astype(mem_ref.dtype)        # logged pre-reset membrane
        return jnp.where(pred, mem - THRESHOLD, mem)  # reset-by-subtraction carry

    if Tc <= 8:
        # Short chunk: fully static unroll (demo path).
        for i in range(Tc):
            mem = lif_step(i, mem, cur_all[i * TB:(i + 1) * TB])
    else:
        # Long chunk: visible fori_loop with modest unroll keeps the LLO scheduler
        # effective while bounding code size and live vreg ranges.
        def body(i, mem):
            row = pl.multiple_of(i * TB, TB)
            cur = jax.lax.dynamic_slice_in_dim(cur_all, row, TB, axis=0)
            return lif_step(i, mem, cur)

        mem = jax.lax.fori_loop(0, Tc, body, mem,
                                unroll=8 if Tc % 8 == 0 else 4)

    # Carry membrane into the next time chunk.
    mem_state[...] = mem


def _pick_batch_tile(B):
    # TB <= 64 keeps the unrolled LIF recurrence register-resident; TB <= B/2
    # leaves >= 2 tiles on the "parallel" axis for v7x's second TensorCore.
    # bf16 outputs need TB to be a whole 16-row sublane tile (or TB == B).
    cap = min(B, 64)
    if cap == B and B > 16:
        cap = max(16, B // 2)
    for tb in range(cap, 15, -1):
        if B % tb == 0 and tb % 16 == 0:
            return tb
    return B  # fallback: full batch (block dim == array dim is always legal)


def _pick_time_chunk(T, TB, target_rows=2048):
    # Target Tc*TB ~ 2K rows (~1 MiB bf16 output blocks at H=128): big enough to
    # approach the HBM roofline and amortize the ~0.35 us/grid-step overhead.
    cap = max(1, min(T, target_rows // max(TB, 1)))
    for tc in range(cap, 0, -1):
        if T % tc == 0:
            return tc
    return 1


def simplified_torch_forward(x, w, b, *, time_chunk=None, batch_tile=None):
    """x: (T, B, F), w: (F, H), b: (1, H) -> (spk_rec, mem_rec), each (T, B, H) bf16."""
    T, B, F = x.shape
    H = w.shape[1]

    TB = batch_tile if batch_tile is not None else _pick_batch_tile(B)
    Tc = time_chunk if time_chunk is not None else _pick_time_chunk(T, TB)
    assert T % Tc == 0, "T must be divisible by the time chunk"
    assert B % TB == 0, "B must be divisible by the batch tile"
    assert TB == B or TB % 16 == 0, \
        "bf16 outputs need a whole 16-row sublane batch tile (or TB == B)"

    # bf16 inputs for the MXU (f32 accumulate in-kernel); bias stays f32 since it
    # is folded into the f32 recurrence.
    x_bf = x.astype(jnp.bfloat16)
    w_bf = w.astype(jnp.bfloat16)
    b_f32 = b.astype(jnp.float32)

    # VMEM budget (lane-padded: F=32 still occupies 128 lanes) so large chunks do
    # not trip the scoped-VMEM default; clamp to v7x's 64 MiB physical VMEM.
    lanes = lambda n: -(-n // 128) * 128
    rows = Tc * TB
    est = (
        2 * rows * lanes(F) * 2           # x block, double-buffered, bf16
        + 2 * 2 * rows * lanes(H) * 2     # spk + mem output blocks, double-buffered
        + rows * lanes(H) * 4             # cur_all f32 temp
        + 2 * F * lanes(H) * 2            # resident weight (2 pipeline buffers)
        + TB * lanes(H) * 4               # f32 membrane carry scratch
        + (2 << 20)                       # headroom for bias / small temps
    )
    vmem_limit = min(max(est, 32 << 20), 64 << 20)

    grid_spec = pltpu.PrefetchScalarGridSpec(
        num_scalar_prefetch=0,
        grid=(B // TB, T // Tc),
        in_specs=[
            pl.BlockSpec((Tc, TB, F), lambda bb, t: (t, bb, 0)),
            # TODO(synk): pipeline_mode=pl.Buffered(1) on w/b (constant index_map)
            # would reclaim the dead second buffer when F/H grow on v7x.
            pl.BlockSpec((F, H), lambda bb, t: (0, 0)),   # weight stays resident
            pl.BlockSpec((1, H), lambda bb, t: (0, 0)),   # bias stays resident
        ],
        out_specs=[
            pl.BlockSpec((Tc, TB, H), lambda bb, t: (t, bb, 0)),
            pl.BlockSpec((Tc, TB, H), lambda bb, t: (t, bb, 0)),
        ],
        scratch_shapes=[pltpu.VMEM((TB, H), jnp.float32)],  # f32 membrane carry
    )

    spk_rec, mem_rec = pl.pallas_call(
        _snn_chunk_kernel,
        out_shape=(
            jax.ShapeDtypeStruct((T, B, H), jnp.bfloat16),
            jax.ShapeDtypeStruct((T, B, H), jnp.bfloat16),
        ),
        grid_spec=grid_spec,
        compiler_params=pltpu.CompilerParams(
            # Batch tiles are independent (v7x 2nd TensorCore); time must stay
            # sequential because of the membrane carry.  Do not reorder the axes.
            dimension_semantics=("parallel", "arbitrary"),
            vmem_limit_bytes=vmem_limit,
        ),
    )(x_bf, w_bf, b_f32)
    return spk_rec, mem_rec


if __name__ == "__main__":
    # Small, TPU-friendly shapes: T=8 timesteps, batch=32, in_features=32, hidden=128.
    T, B, F, H = 8, 32, 32, 128

    key = jax.random.PRNGKey(0)
    kx, kw, kb = jax.random.split(key, 3)
    x = jax.random.normal(kx, (T, B, F), dtype=jnp.float32)
    # Deterministic "Linear" parameters (synthetic init, no checkpoint load).
    w = jax.random.normal(kw, (F, H), dtype=jnp.float32) * 0.1
    b = jax.random.normal(kb, (1, H), dtype=jnp.float32) * 0.01

    spk_rec, mem_rec = simplified_torch_forward(x, w, b)
    jax.block_until_ready((spk_rec, mem_rec))

    # Pure-JAX reference (time-stepped LIF) using the same bf16-input / f32-acc
    # matmul as the kernel, so the spike pattern matches.
    def ref(x, w, b):
        xb = x.astype(jnp.bfloat16)
        wb = w.astype(jnp.bfloat16)

        def step(mem, x_t):
            cur = jnp.dot(x_t, wb, preferred_element_type=jnp.float32)
            mem_new = BETA * mem + cur + b
            spk = (mem_new > THRESHOLD).astype(jnp.float32)
            return mem_new - spk * THRESHOLD, (spk, mem_new)

        _, (spk_r, mem_r) = jax.lax.scan(step, jnp.zeros((B, H), jnp.float32), xb)
        return spk_r, mem_r

    spk_ref, mem_ref = ref(x, w, b)
    assert jnp.allclose(spk_rec.astype(jnp.float32), spk_ref), "spike mismatch"
    # mem_rec is the bf16-logged pre-reset membrane (the f32 carry is unaffected).
    assert jnp.allclose(mem_rec.astype(jnp.float32), mem_ref, atol=5e-2, rtol=2e-2), \
        "membrane mismatch"

    print("KERNEL_OK")
</pallas_src>

<mosaic_0001>
module attributes {stable_mosaic.version = 11 : i64} {
  func.func @_snn_chunk_kernel(%arg0: i32, %arg1: i32, %arg2: memref<8x16x32xbf16, #tpu.memory_space<vmem>>, %arg3: memref<32x128xbf16, #tpu.memory_space<vmem>>, %arg4: memref<1x128xf32, #tpu.memory_space<vmem>>, %arg5: memref<8x16x128xbf16, #tpu.memory_space<vmem>>, %arg6: memref<8x16x128xbf16, #tpu.memory_space<vmem>>, %arg7: memref<16x128xf32, #tpu.memory_space<vmem>>) attributes {dimension_semantics = [#tpu.dimension_semantics<parallel>, #tpu.dimension_semantics<arbitrary>], iteration_bounds = array<i64: 2, 1>, scalar_prefetch = 0 : i64, scratch_operands = 1 : i64, tpu.core_type = #tpu.core_type<tc>, window_params = [{transform_indices = @transform_0, window_bounds = array<i64: 8, 16, 32>}, {pipeline_mode = #tpu.pipeline_mode<synchronous>, transform_indices = @transform_1, window_bounds = array<i64: 32, 128>}, {pipeline_mode = #tpu.pipeline_mode<synchronous>, transform_indices = @transform_2, window_bounds = array<i64: 1, 128>}, {transform_indices = @transform_3, window_bounds = array<i64: 8, 16, 128>}, {transform_indices = @transform_4, window_bounds = array<i64: 8, 16, 128>}]} {
    %c0_i32 = arith.constant 0 : i32
    %0 = arith.cmpi eq, %arg1, %c0_i32 : i32
    %1 = arith.extui %0 : i1 to i32
    %c0_i32_0 = arith.constant 0 : i32
    %2 = arith.cmpi ne, %1, %c0_i32_0 : i32
    scf.if %2 {
      %cst_76 = arith.constant 0.000000e+00 : f32
      %172 = vector.broadcast %cst_76 : f32 to vector<16x128xf32>
      %c0_77 = arith.constant 0 : index
      %c0_78 = arith.constant 0 : index
      %173 = vector.load %arg7[%c0_77, %c0_78] : memref<16x128xf32, #tpu.memory_space<vmem>>, vector<16x128xf32>
      tpu.vector_store %arg7[%c0_77, %c0_78], %172 {strides = array<i32>} : memref<16x128xf32, #tpu.memory_space<vmem>>, vector<16x128xf32>,
    } else {
    }
    %c0 = arith.constant 0 : index
    %c0_1 = arith.constant 0 : index
    %c0_2 = arith.constant 0 : index
    %3 = vector.load %arg2[%c0, %c0_1, %c0_2] : memref<8x16x32xbf16, #tpu.memory_space<vmem>>, vector<8x16x32xbf16>
    %4 = vector.shape_cast %3 : vector<8x16x32xbf16> to vector<128x32xbf16>
    %c0_3 = arith.constant 0 : index
    %c0_4 = arith.constant 0 : index
    %5 = vector.load %arg3[%c0_3, %c0_4] : memref<32x128xbf16, #tpu.memory_space<vmem>>, vector<32x128xbf16>
    %cst = arith.constant dense<0.000000e+00> : vector<128x128xf32>
    %6 = tpu.matmul %4, %5, %cst {dimension_numbers = #tpu.dot_dimension_numbers<[1], [0], [0], [1], [0, 0, 1, 1], [], []>} : vector<128x32xbf16>, vector<32x128xbf16>, vector<128x128xf32> -> vector<128x128xf32>
    %c0_5 = arith.constant 0 : index
    %c0_6 = arith.constant 0 : index
    %7 = vector.load %arg4[%c0_5, %c0_6] : memref<1x128xf32, #tpu.memory_space<vmem>>, vector<1x128xf32>
    %8 = vector.shape_cast %7 : vector<1x128xf32> to vector<1x128xf32>
    %9 = vector.broadcast %8 : vector<1x128xf32> to vector<16x128xf32>
    %c0_7 = arith.constant 0 : index
    %c0_8 = arith.constant 0 : index
    %10 = vector.load %arg7[%c0_7, %c0_8] : memref<16x128xf32, #tpu.memory_space<vmem>>, vector<16x128xf32>
    %11 = vector.extract_strided_slice %6 {offsets = [0, 0], sizes = [16, 128], strides = [1, 1]} : vector<128x128xf32> to vector<16x128xf32>
    %cst_9 = arith.constant 0.899999976 : f32
    %12 = vector.broadcast %cst_9 : f32 to vector<16x128xf32>
    %13 = arith.mulf %12, %10 : vector<16x128xf32>
    %14 = arith.addf %13, %11 : vector<16x128xf32>
    %15 = arith.addf %14, %9 : vector<16x128xf32>
    %cst_10 = arith.constant 1.000000e+00 : f32
    %16 = vector.broadcast %cst_10 : f32 to vector<16x128xf32>
    %17 = arith.cmpf ogt, %15, %16 : vector<16x128xf32>
    %18 = arith.extui %17 : vector<16x128xi1> to vector<16x128xi32>
    %19 = arith.sitofp %18 : vector<16x128xi32> to vector<16x128xf32>
    %20 = arith.truncf %19 : vector<16x128xf32> to vector<16x128xbf16>
    %c0_11 = arith.constant 0 : index
    %c0_12 = arith.constant 0 : index
    %c0_13 = arith.constant 0 : index
    %21 = vector.load %arg5[%c0_11, %c0_12, %c0_13] : memref<8x16x128xbf16, #tpu.memory_space<vmem>>, vector<1x16x128xbf16>
    %22 = vector.shape_cast %21 : vector<1x16x128xbf16> to vector<16x128xbf16>
    %23 = vector.shape_cast %20 : vector<16x128xbf16> to vector<1x16x128xbf16>
    tpu.vector_store %arg5[%c0_11, %c0_12, %c0_13], %23 {strides = array<i32>} : memref<8x16x128xbf16, #tpu.memory_space<vmem>>, vector<1x16x128xbf16>,
    %24 = arith.truncf %15 : vector<16x128xf32> to vector<16x128xbf16>
    %c0_14 = arith.constant 0 : index
    %c0_15 = arith.constant 0 : index
    %c0_16 = arith.constant 0 : index
    %25 = vector.load %arg6[%c0_14, %c0_15, %c0_16] : memref<8x16x128xbf16, #tpu.memory_space<vmem>>, vector<1x16x128xbf16>
    %26 = vector.shape_cast %25 : vector<1x16x128xbf16> to vector<16x128xbf16>
    %27 = vector.shape_cast %24 : vector<16x128xbf16> to vector<1x16x128xbf16>
    tpu.vector_store %arg6[%c0_14, %c0_15, %c0_16], %27 {strides = array<i32>} : memref<8x16x128xbf16, #tpu.memory_space<vmem>>, vector<1x16x128xbf16>,
    %cst_17 = arith.constant 1.000000e+00 : f32
    %28 = vector.broadcast %cst_17 : f32 to vector<16x128xf32>
    %29 = arith.subf %15, %28 : vector<16x128xf32>
    %30 = arith.select %17, %29, %15 : vector<16x128xi1>, vector<16x128xf32>
    %31 = vector.extract_strided_slice %6 {offsets = [16, 0], sizes = [16, 128], strides = [1, 1]} : vector<128x128xf32> to vector<16x128xf32>
    %cst_18 = arith.constant 0.899999976 : f32
    %32 = vector.broadcast %cst_18 : f32 to vector<16x128xf32>
    %33 = arith.mulf %32, %30 : vector<16x128xf32>
    %34 = arith.addf %33, %31 : vector<16x128xf32>
    %35 = arith.addf %34, %9 : vector<16x128xf32>
    %cst_19 = arith.constant 1.000000e+00 : f32
    %36 = vector.broadcast %cst_19 : f32 to vector<16x128xf32>
    %37 = arith.cmpf ogt, %35, %36 : vector<16x128xf32>
    %38 = arith.extui %37 : vector<16x128xi1> to vector<16x128xi32>
    %39 = arith.sitofp %38 : vector<16x128xi32> to vector<16x128xf32>
    %40 = arith.truncf %39 : vector<16x128xf32> to vector<16x128xbf16>
    %c1 = arith.constant 1 : index
    %c0_20 = arith.constant 0 : index
    %c0_21 = arith.constant 0 : index
    %41 = vector.load %arg5[%c1, %c0_20, %c0_21] : memref<8x16x128xbf16, #tpu.memory_space<vmem>>, vector<1x16x128xbf16>
    %42 = vector.shape_cast %41 : vector<1x16x128xbf16> to vector<16x128xbf16>
    %43 = vector.shape_cast %40 : vector<16x128xbf16> to vector<1x16x128xbf16>
    tpu.vector_store %arg5[%c1, %c0_20, %c0_21], %43 {strides = array<i32>} : memref<8x16x128xbf16, #tpu.memory_space<vmem>>, vector<1x16x128xbf16>,
    %44 = arith.truncf %35 : vector<16x128xf32> to vector<16x128xbf16>
    %c1_22 = arith.constant 1 : index
    %c0_23 = arith.constant 0 : index
    %c0_24 = arith.constant 0 : index
    %45 = vector.load %arg6[%c1_22, %c0_23, %c0_24] : memref<8x16x128xbf16, #tpu.memory_space<vmem>>, vector<1x16x128xbf16>
    %46 = vector.shape_cast %45 : vector<1x16x128xbf16> to vector<16x128xbf16>
    %47 = vector.shape_cast %44 : vector<16x128xbf16> to vector<1x16x128xbf16>
    tpu.vector_store %arg6[%c1_22, %c0_23, %c0_24], %47 {strides = array<i32>} : memref<8x16x128xbf16, #tpu.memory_space<vmem>>, vector<1x16x128xbf16>,
    %cst_25 = arith.constant 1.000000e+00 : f32
    %48 = vector.broadcast %cst_25 : f32 to vector<16x128xf32>
    %49 = arith.subf %35, %48 : vector<16x128xf32>
    %50 = arith.select %37, %49, %35 : vector<16x128xi1>, vector<16x128xf32>
    %51 = vector.extract_strided_slice %6 {offsets = [32, 0], sizes = [16, 128], strides = [1, 1]} : vector<128x128xf32> to vector<16x128xf32>
    %cst_26 = arith.constant 0.899999976 : f32
    %52 = vector.broadcast %cst_26 : f32 to vector<16x128xf32>
    %53 = arith.mulf %52, %50 : vector<16x128xf32>
    %54 = arith.addf %53, %51 : vector<16x128xf32>
    %55 = arith.addf %54, %9 : vector<16x128xf32>
    %cst_27 = arith.constant 1.000000e+00 : f32
    %56 = vector.broadcast %cst_27 : f32 to vector<16x128xf32>
    %57 = arith.cmpf ogt, %55, %56 : vector<16x128xf32>
    %58 = arith.extui %57 : vector<16x128xi1> to vector<16x128xi32>
    %59 = arith.sitofp %58 : vector<16x128xi32> to vector<16x128xf32>
    %60 = arith.truncf %59 : vector<16x128xf32> to vector<16x128xbf16>
    %c2 = arith.constant 2 : index
    %c0_28 = arith.constant 0 : index
    %c0_29 = arith.constant 0 : index
    %61 = vector.load %arg5[%c2, %c0_28, %c0_29] : memref<8x16x128xbf16, #tpu.memory_space<vmem>>, vector<1x16x128xbf16>
    %62 = vector.shape_cast %61 : vector<1x16x128xbf16> to vector<16x128xbf16>
    %63 = vector.shape_cast %60 : vector<16x128xbf16> to vector<1x16x128xbf16>
    tpu.vector_store %arg5[%c2, %c0_28, %c0_29], %63 {strides = array<i32>} : memref<8x16x128xbf16, #tpu.memory_space<vmem>>, vector<1x16x128xbf16>,
    %64 = arith.truncf %55 : vector<16x128xf32> to vector<16x128xbf16>
    %c2_30 = arith.constant 2 : index
    %c0_31 = arith.constant 0 : index
    %c0_32 = arith.constant 0 : index
    %65 = vector.load %arg6[%c2_30, %c0_31, %c0_32] : memref<8x16x128xbf16, #tpu.memory_space<vmem>>, vector<1x16x128xbf16>
    %66 = vector.shape_cast %65 : vector<1x16x128xbf16> to vector<16x128xbf16>
    %67 = vector.shape_cast %64 : vector<16x128xbf16> to vector<1x16x128xbf16>
    tpu.vector_store %arg6[%c2_30, %c0_31, %c0_32], %67 {strides = array<i32>} : memref<8x16x128xbf16, #tpu.memory_space<vmem>>, vector<1x16x128xbf16>,
    %cst_33 = arith.constant 1.000000e+00 : f32
    %68 = vector.broadcast %cst_33 : f32 to vector<16x128xf32>
    %69 = arith.subf %55, %68 : vector<16x128xf32>
    %70 = arith.select %57, %69, %55 : vector<16x128xi1>, vector<16x128xf32>
    %71 = vector.extract_strided_slice %6 {offsets = [48, 0], sizes = [16, 128], strides = [1, 1]} : vector<128x128xf32> to vector<16x128xf32>
    %cst_34 = arith.constant 0.899999976 : f32
    %72 = vector.broadcast %cst_34 : f32 to vector<16x128xf32>
    %73 = arith.mulf %72, %70 : vector<16x128xf32>
    %74 = arith.addf %73, %71 : vector<16x128xf32>
    %75 = arith.addf %74, %9 : vector<16x128xf32>
    %cst_35 = arith.constant 1.000000e+00 : f32
    %76 = vector.broadcast %cst_35 : f32 to vector<16x128xf32>
    %77 = arith.cmpf ogt, %75, %76 : vector<16x128xf32>
    %78 = arith.extui %77 : vector<16x128xi1> to vector<16x128xi32>
    %79 = arith.sitofp %78 : vector<16x128xi32> to vector<16x128xf32>
    %80 = arith.truncf %79 : vector<16x128xf32> to vector<16x128xbf16>
    %c3 = arith.constant 3 : index
    %c0_36 = arith.constant 0 : index
    %c0_37 = arith.constant 0 : index
    %81 = vector.load %arg5[%c3, %c0_36, %c0_37] : memref<8x16x128xbf16, #tpu.memory_space<vmem>>, vector<1x16x128xbf16>
    %82 = vector.shape_cast %81 : vector<1x16x128xbf16> to vector<16x128xbf16>
    %83 = vector.shape_cast %80 : vector<16x128xbf16> to vector<1x16x128xbf16>
    tpu.vector_store %arg5[%c3, %c0_36, %c0_37], %83 {strides = array<i32>} : memref<8x16x128xbf16, #tpu.memory_space<vmem>>, vector<1x16x128xbf16>,
    %84 = arith.truncf %75 : vector<16x128xf32> to vector<16x128xbf16>
    %c3_38 = arith.constant 3 : index
    %c0_39 = arith.constant 0 : index
    %c0_40 = arith.constant 0 : index
    %85 = vector.load %arg6[%c3_38, %c0_39, %c0_40] : memref<8x16x128xbf16, #tpu.memory_space<vmem>>, vector<1x16x128xbf16>
    %86 = vector.shape_cast %85 : vector<1x16x128xbf16> to vector<16x128xbf16>
    %87 = vector.shape_cast %84 : vector<16x128xbf16> to vector<1x16x128xbf16>
    tpu.vector_store %arg6[%c3_38, %c0_39, %c0_40], %87 {strides = array<i32>} : memref<8x16x128xbf16, #tpu.memory_space<vmem>>, vector<1x16x128xbf16>,
    %cst_41 = arith.constant 1.000000e+00 : f32
    %88 = vector.broadcast %cst_41 : f32 to vector<16x128xf32>
    %89 = arith.subf %75, %88 : vector<16x128xf32>
    %90 = arith.select %77, %89, %75 : vector<16x128xi1>, vector<16x128xf32>
    %91 = vector.extract_strided_slice %6 {offsets = [64, 0], sizes = [16, 128], strides = [1, 1]} : vector<128x128xf32> to vector<16x128xf32>
    %cst_42 = arith.constant 0.899999976 : f32
    %92 = vector.broadcast %cst_42 : f32 to vector<16x128xf32>
    %93 = arith.mulf %92, %90 : vector<16x128xf32>
    %94 = arith.addf %93, %91 : vector<16x128xf32>
    %95 = arith.addf %94, %9 : vector<16x128xf32>
    %cst_43 = arith.constant 1.000000e+00 : f32
    %96 = vector.broadcast %cst_43 : f32 to vector<16x128xf32>
    %97 = arith.cmpf ogt, %95, %96 : vector<16x128xf32>
    %98 = arith.extui %97 : vector<16x128xi1> to vector<16x128xi32>
    %99 = arith.sitofp %98 : vector<16x128xi32> to vector<16x128xf32>
    %100 = arith.truncf %99 : vector<16x128xf32> to vector<16x128xbf16>
    %c4 = arith.constant 4 : index
    %c0_44 = arith.constant 0 : index
    %c0_45 = arith.constant 0 : index
    %101 = vector.load %arg5[%c4, %c0_44, %c0_45] : memref<8x16x128xbf16, #tpu.memory_space<vmem>>, vector<1x16x128xbf16>
    %102 = vector.shape_cast %101 : vector<1x16x128xbf16> to vector<16x128xbf16>
    %103 = vector.shape_cast %100 : vector<16x128xbf16> to vector<1x16x128xbf16>
    tpu.vector_store %arg5[%c4, %c0_44, %c0_45], %103 {strides = array<i32>} : memref<8x16x128xbf16, #tpu.memory_space<vmem>>, vector<1x16x128xbf16>,
    %104 = arith.truncf %95 : vector<16x128xf32> to vector<16x128xbf16>
    %c4_46 = arith.constant 4 : index
    %c0_47 = arith.constant 0 : index
    %c0_48 = arith.constant 0 : index
    %105 = vector.load %arg6[%c4_46, %c0_47, %c0_48] : memref<8x16x128xbf16, #tpu.memory_space<vmem>>, vector<1x16x128xbf16>
    %106 = vector.shape_cast %105 : vector<1x16x128xbf16> to vector<16x128xbf16>
    %107 = vector.shape_cast %104 : vector<16x128xbf16> to vector<1x16x128xbf16>
    tpu.vector_store %arg6[%c4_46, %c0_47, %c0_48], %107 {strides = array<i32>} : memref<8x16x128xbf16, #tpu.memory_space<vmem>>, vector<1x16x128xbf16>,
    %cst_49 = arith.constant 1.000000e+00 : f32
    %108 = vector.broadcast %cst_49 : f32 to vector<16x128xf32>
    %109 = arith.subf %95, %108 : vector<16x128xf32>
    %110 = arith.select %97, %109, %95 : vector<16x128xi1>, vector<16x128xf32>
    %111 = vector.extract_strided_slice %6 {offsets = [80, 0], sizes = [16, 128], strides = [1, 1]} : vector<128x128xf32> to vector<16x128xf32>
    %cst_50 = arith.constant 0.899999976 : f32
    %112 = vector.broadcast %cst_50 : f32 to vector<16x128xf32>
    %113 = arith.mulf %112, %110 : vector<16x128xf32>
    %114 = arith.addf %113, %111 : vector<16x128xf32>
    %115 = arith.addf %114, %9 : vector<16x128xf32>
    %cst_51 = arith.constant 1.000000e+00 : f32
    %116 = vector.broadcast %cst_51 : f32 to vector<16x128xf32>
    %117 = arith.cmpf ogt, %115, %116 : vector<16x128xf32>
    %118 = arith.extui %117 : vector<16x128xi1> to vector<16x128xi32>
    %119 = arith.sitofp %118 : vector<16x128xi32> to vector<16x128xf32>
    %120 = arith.truncf %119 : vector<16x128xf32> to vector<16x128xbf16>
    %c5 = arith.constant 5 : index
    %c0_52 = arith.constant 0 : index
    %c0_53 = arith.constant 0 : index
    %121 = vector.load %arg5[%c5, %c0_52, %c0_53] : memref<8x16x128xbf16, #tpu.memory_space<vmem>>, vector<1x16x128xbf16>
    %122 = vector.shape_cast %121 : vector<1x16x128xbf16> to vector<16x128xbf16>
    %123 = vector.shape_cast %120 : vector<16x128xbf16> to vector<1x16x128xbf16>
    tpu.vector_store %arg5[%c5, %c0_52, %c0_53], %123 {strides = array<i32>} : memref<8x16x128xbf16, #tpu.memory_space<vmem>>, vector<1x16x128xbf16>,
    %124 = arith.truncf %115 : vector<16x128xf32> to vector<16x128xbf16>
    %c5_54 = arith.constant 5 : index
    %c0_55 = arith.constant 0 : index
    %c0_56 = arith.constant 0 : index
    %125 = vector.load %arg6[%c5_54, %c0_55, %c0_56] : memref<8x16x128xbf16, #tpu.memory_space<vmem>>, vector<1x16x128xbf16>
    %126 = vector.shape_cast %125 : vector<1x16x128xbf16> to vector<16x128xbf16>
    %127 = vector.shape_cast %124 : vector<16x128xbf16> to vector<1x16x128xbf16>
    tpu.vector_store %arg6[%c5_54, %c0_55, %c0_56], %127 {strides = array<i32>} : memref<8x16x128xbf16, #tpu.memory_space<vmem>>, vector<1x16x128xbf16>,
    %cst_57 = arith.constant 1.000000e+00 : f32
    %128 = vector.broadcast %cst_57 : f32 to vector<16x128xf32>
    %129 = arith.subf %115, %128 : vector<16x128xf32>
    %130 = arith.select %117, %129, %115 : vector<16x128xi1>, vector<16x128xf32>
    %131 = vector.extract_strided_slice %6 {offsets = [96, 0], sizes = [16, 128], strides = [1, 1]} : vector<128x128xf32> to vector<16x128xf32>
    %cst_58 = arith.constant 0.899999976 : f32
    %132 = vector.broadcast %cst_58 : f32 to vector<16x128xf32>
    %133 = arith.mulf %132, %130 : vector<16x128xf32>
    %134 = arith.addf %133, %131 : vector<16x128xf32>
    %135 = arith.addf %134, %9 : vector<16x128xf32>
    %cst_59 = arith.constant 1.000000e+00 : f32
    %136 = vector.broadcast %cst_59 : f32 to vector<16x128xf32>
    %137 = arith.cmpf ogt, %135, %136 : vector<16x128xf32>
    %138 = arith.extui %137 : vector<16x128xi1> to vector<16x128xi32>
    %139 = arith.sitofp %138 : vector<16x128xi32> to vector<16x128xf32>
    %140 = arith.truncf %139 : vector<16x128xf32> to vector<16x128xbf16>
    %c6 = arith.constant 6 : index
    %c0_60 = arith.constant 0 : index
    %c0_61 = arith.constant 0 : index
    %141 = vector.load %arg5[%c6, %c0_60, %c0_61] : memref<8x16x128xbf16, #tpu.memory_space<vmem>>, vector<1x16x128xbf16>
    %142 = vector.shape_cast %141 : vector<1x16x128xbf16> to vector<16x128xbf16>
    %143 = vector.shape_cast %140 : vector<16x128xbf16> to vector<1x16x128xbf16>
    tpu.vector_store %arg5[%c6, %c0_60, %c0_61], %143 {strides = array<i32>} : memref<8x16x128xbf16, #tpu.memory_space<vmem>>, vector<1x16x128xbf16>,
    %144 = arith.truncf %135 : vector<16x128xf32> to vector<16x128xbf16>
    %c6_62 = arith.constant 6 : index
    %c0_63 = arith.constant 0 : index
    %c0_64 = arith.constant 0 : index
    %145 = vector.load %arg6[%c6_62, %c0_63, %c0_64] : memref<8x16x128xbf16, #tpu.memory_space<vmem>>, vector<1x16x128xbf16>
    %146 = vector.shape_cast %145 : vector<1x16x128xbf16> to vector<16x128xbf16>
    %147 = vector.shape_cast %144 : vector<16x128xbf16> to vector<1x16x128xbf16>
    tpu.vector_store %arg6[%c6_62, %c0_63, %c0_64], %147 {strides = array<i32>} : memref<8x16x128xbf16, #tpu.memory_space<vmem>>, vector<1x16x128xbf16>,
    %cst_65 = arith.constant 1.000000e+00 : f32
    %148 = vector.broadcast %cst_65 : f32 to vector<16x128xf32>
    %149 = arith.subf %135, %148 : vector<16x128xf32>
    %150 = arith.select %137, %149, %135 : vector<16x128xi1>, vector<16x128xf32>
    %151 = vector.extract_strided_slice %6 {offsets = [112, 0], sizes = [16, 128], strides = [1, 1]} : vector<128x128xf32> to vector<16x128xf32>
    %cst_66 = arith.constant 0.899999976 : f32
    %152 = vector.broadcast %cst_66 : f32 to vector<16x128xf32>
    %153 = arith.mulf %152, %150 : vector<16x128xf32>
    %154 = arith.addf %153, %151 : vector<16x128xf32>
    %155 = arith.addf %154, %9 : vector<16x128xf32>
    %cst_67 = arith.constant 1.000000e+00 : f32
    %156 = vector.broadcast %cst_67 : f32 to vector<16x128xf32>
    %157 = arith.cmpf ogt, %155, %156 : vector<16x128xf32>
    %158 = arith.extui %157 : vector<16x128xi1> to vector<16x128xi32>
    %159 = arith.sitofp %158 : vector<16x128xi32> to vector<16x128xf32>
    %160 = arith.truncf %159 : vector<16x128xf32> to vector<16x128xbf16>
    %c7 = arith.constant 7 : index
    %c0_68 = arith.constant 0 : index
    %c0_69 = arith.constant 0 : index
    %161 = vector.load %arg5[%c7, %c0_68, %c0_69] : memref<8x16x128xbf16, #tpu.memory_space<vmem>>, vector<1x16x128xbf16>
    %162 = vector.shape_cast %161 : vector<1x16x128xbf16> to vector<16x128xbf16>
    %163 = vector.shape_cast %160 : vector<16x128xbf16> to vector<1x16x128xbf16>
    tpu.vector_store %arg5[%c7, %c0_68, %c0_69], %163 {strides = array<i32>} : memref<8x16x128xbf16, #tpu.memory_space<vmem>>, vector<1x16x128xbf16>,
    %164 = arith.truncf %155 : vector<16x128xf32> to vector<16x128xbf16>
    %c7_70 = arith.constant 7 : index
    %c0_71 = arith.constant 0 : index
    %c0_72 = arith.constant 0 : index
    %165 = vector.load %arg6[%c7_70, %c0_71, %c0_72] : memref<8x16x128xbf16, #tpu.memory_space<vmem>>, vector<1x16x128xbf16>
    %166 = vector.shape_cast %165 : vector<1x16x128xbf16> to vector<16x128xbf16>
    %167 = vector.shape_cast %164 : vector<16x128xbf16> to vector<1x16x128xbf16>
    tpu.vector_store %arg6[%c7_70, %c0_71, %c0_72], %167 {strides = array<i32>} : memref<8x16x128xbf16, #tpu.memory_space<vmem>>, vector<1x16x128xbf16>,
    %cst_73 = arith.constant 1.000000e+00 : f32
    %168 = vector.broadcast %cst_73 : f32 to vector<16x128xf32>
    %169 = arith.subf %155, %168 : vector<16x128xf32>
    %170 = arith.select %157, %169, %155 : vector<16x128xi1>, vector<16x128xf32>
    %c0_74 = arith.constant 0 : index
    %c0_75 = arith.constant 0 : index
    %171 = vector.load %arg7[%c0_74, %c0_75] : memref<16x128xf32, #tpu.memory_space<vmem>>, vector<16x128xf32>
    tpu.vector_store %arg7[%c0_74, %c0_75], %170 {strides = array<i32>} : memref<16x128xf32, #tpu.memory_space<vmem>>, vector<16x128xf32>,
    return
  }
  func.func @transform_0(%arg0: i32, %arg1: i32) -> (i32, i32, i32) {
    %c0_i32 = arith.constant 0 : i32
    %c0_i32_0 = arith.constant 0 : i32
    return %arg1, %arg0, %c0_i32 : i32, i32, i32
  }
  func.func @transform_1(%arg0: i32, %arg1: i32) -> (i32, i32) {
    %c0_i32 = arith.constant 0 : i32
    %c0_i32_0 = arith.constant 0 : i32
    %c0_i32_1 = arith.constant 0 : i32
    return %c0_i32, %c0_i32_0 : i32, i32
  }
  func.func @transform_2(%arg0: i32, %arg1: i32) -> (i32, i32) {
    %c0_i32 = arith.constant 0 : i32
    %c0_i32_0 = arith.constant 0 : i32
    %c0_i32_1 = arith.constant 0 : i32
    return %c0_i32, %c0_i32_0 : i32, i32
  }
  func.func @transform_3(%arg0: i32, %arg1: i32) -> (i32, i32, i32) {
    %c0_i32 = arith.constant 0 : i32
    %c0_i32_0 = arith.constant 0 : i32
    return %arg1, %arg0, %c0_i32 : i32, i32, i32
  }
  func.func @transform_4(%arg0: i32, %arg1: i32) -> (i32, i32, i32) {
    %c0_i32 = arith.constant 0 : i32
    %c0_i32_0 = arith.constant 0 : i32
    return %arg1, %arg0, %c0_i32 : i32, i32, i32
  }
}

</mosaic_0001>

<bundles_post_ra>
// kernel: tpu_custom_call.1
= control target key start
LH: loop header
LB: loop body
LE: loop exit
PB: predicated region body
PF: predicated region fallthrough
CT: control target
= control target key end

     0   :  { %s1881_s0 = inlined_call_operand.hbm [shape: bf16[8,32,32], index: 0, kind: input, shape index: {}]   ;;  %s1882_s1 = inlined_call_operand.hbm [shape: bf16[32,128], index: 1, kind: input, shape index: {}]   ;;  %s1883_s2 = inlined_call_operand.vmem [shape: f32[1,128], index: 2, kind: input, shape index: {}]   ;;  %s1884_s3 = inlined_call_operand.hbm [shape: bf16[8,32,128], index: 3, kind: output, shape index: {0}]   ;;  %s1885_s4 = inlined_call_operand.hbm [shape: bf16[8,32,128], index: 4, kind: output, shape index: {1}]  }
   0x1   :  { %1893 = sst [smem:[#allocation23_spill]] %s1882_s1 }
   0x2   :  { %10 = vsyncpa [#allocation4], 0 }
   0x3   :  { %12 = vsyncpa [#allocation4 + $0x1], 0 }
   0x4   :  { %13 = vsyncpa [#allocation7], 0 }
   0x5   :  { %14 = vsyncpa [#allocation5], 0 }
   0x6   :  { %16 = vsyncpa [#allocation5 + $0x1], 0 }
   0x7   :  { %17 = vsyncpa [#allocation10], 0 }
   0x8   :  { %19 = vsyncpa [#allocation10 + $0x1], 0  ;;  %s1586_s15 = smov 0   ;;  %s1588_s16 = smov 0  }
   0x9   :  { %s1590_s17 = smov 0   ;;  %s1592_s18 = smov 0  }
   0xa   :  { %s1594_s19 = smov 0   ;;  %s1596_s20 = smov 0  }
   0xb LB: > { %s1039_s21 = sadd.s32 4294967295, %s1535_s20   ;;  %s1040_s22 = sadd.s32 4294967294, %s1535_s20   ;;  %s1535_s20 = sphi %s1596_s20, %s25_s20   ;;  %s1531_s19 = sphi %s1594_s19, %s1914_s19   ;;  %s1527_s18 = sphi %s1592_s18, %s1913_s18   ;;  %s1523_s17 = sphi %s1590_s17, %s1912_s17   ;;  %s1519_s16 = sphi %s1588_s16, %s1911_s16   ;;  %s1515_s15 = sphi %s1586_s15, %s1910_s15  }
   0xc   : > { %s37_s23 = sadd.s32 1, %s1531_s19  ;;  %s46_s24 = sadd.s32 1, %s1523_s17 }
   0xd   : > { %p39_p0 = scmp.ge.s32.totalorder %s37_s23, 2  ;;  %p53_p1 = scmp.ne.s32.totalorder %s1523_s17, %s1519_s16 }
   0xe   : > { %p54_p2 = scmp.eq.s32.totalorder %s1535_s20, 0  ;;  %p59_p3 = scmp.ne.s32.totalorder %s1519_s16, %s1515_s15 }
   0xf   : > { %s1916_s23 = smov (%p39_p0, %s37_s23), 0  ;;  %p1631_p5 = scmp.eq.s32.totalorder %s1039_s21, 0 }
  0x10   : > { %1894 = sst [smem:[#allocation22_spill]] %s1916_s23  ;;  %p1627_p4 = por %p54_p2, %p53_p1 }
  0x11   : > { %s1896_s26 = scalar_select %p1631_p5, 1, 0 }
  0x12   : > { %s1895_s25 = scalar_select %p1627_p4, 1, 0 }
  0x13   : > { %s42_s27 = ssub.s32 %s1531_s19, %s1916_s23  ;;  %p127_p6 = scmp.eq.s32.totalorder %s1039_s21, 1 }
  0x14   : > { %p44_p7 = scmp.eq.s32.totalorder %s42_s27, 0  ;;  %p1639_p8 = por %p1631_p5, %p59_p3 }
  0x15   : > { %p1643_p9 = por %p127_p6, %p53_p1  ;;  %p133_p10 = scmp.eq.s32.totalorder %s1040_s22, 1 }
  0x16   : > { %s1897_s28 = scalar_select %p1639_p8, 1, 0 }
  0x17   : > { %s1898_s29 = scalar_select %p1643_p9, 1, 0 }
  0x18   : > { %s1648_s30 = scalar_select %p44_p7, %s1523_s17, %s46_s24  }
  0x19   : > { %p1650_p11 = por %p133_p10, %p59_p3  ;;  %p1041_p12 = scmp.ge.s32.totalorder %s1535_s20, 1 }
  0x1a   : > { %p168_p13 = scmp.lt.s32.totalorder %s1535_s20, 3  ;;  %s1537_s7 = smov [#allocation6]  }
  0x1b   : > { %s1899_s5 = scalar_select %p1650_p11, 1, 0 }
  0x1c   : > { %p1656_p0 = pnand %p1041_p12, %p168_p13  ;;  %s180_s8 = sshll.u32 %s1537_s7, 4  ;;  %s181_s8 = int_to_ptr.vmem [resolvable:$true] %s180_s8 }
  0x1d   : > { %s1902_s1 = sld [smem:[#allocation23_spill]] }
  0x1e   : > { %s1900_s6 = scalar_select %p1656_p0, 1, 0 }
  0x1f   : > { %p1349_p1 = pneg %p1656_p0 }
  0x21   : > { %p1664_p2 = pnand %p1349_p1, %p1631_p5 }
  0x23   : > { %s1445_s12 = scalar_lea.hbm %s1902_s1, 256  ;;  %p1447_p6 = pneg %p1664_p2 }
  0x24   : > { %p1446_p3 = scmp.ne.s32.totalorder %s1902_s1, %s1445_s12  ;;  %p1452_p12 = scmp.lt.u32.totalorder %s1445_s12, %s1902_s1 }
  0x26   : > { %p1448_p7 = pnand %p1447_p6, %p1446_p3 }
  0x28   : > { %p1449_p10 = pneg %p1448_p7 }
  0x2a   : > { %p1454_p13 = pnand %p1452_p12, %p1449_p10 }
  0x2c   : > { %1457 = shalt.err (!%p1454_p13)
}
  0x2d   : > { %s1458_s24 = scalar_lea.vmem %s181_s8, 256  ;;  %p1466_p5 = scmp.lt.s32.totalorder %s181_s8, %s181_s8 }
  0x2e   : > { %p1459_p1 = scmp.ne.s32.totalorder %s181_s8, %s1458_s24  ;;  %p1467_p8 = scmp.lt.s32.totalorder %s1458_s24, %s1458_s24 }
  0x30   : > { %p1461_p11 = pnand %p1459_p1, %p1447_p6  ;;  %p1468_p0 = por %p1467_p8, %p1466_p5 }
  0x32   : > { %p1462_p9 = pneg %p1461_p11 }
  0x34   : > { %p1469_p4 = pnand %p1468_p0, %p1462_p9 }
  0x36   : > { %1472 = shalt.err (!%p1469_p4)
}
  0x37   : > { %s1538_s27 = smov 64   ;;  %s1539_s7 = smov 4  }
  0x38   : > { %1352 = dma.hbm_to_vmem [thread:$0]  (!%p1664_p2), %s1902_s1, 256, %s181_s8, [#allocation7], %s1538_s27, %s1538_s27, %s1539_s7  }
  0x39   : > { %p1043_p3 = scmp.ge.s32.totalorder %s1535_s20, 2 }
  0x3b   : > { %193 = sbr.rel (%p1043_p3) target bundleno = 81 (0x51), region = 24 }
  0x42   : > { %s197_s12 = sand.u32 1, %s1523_s17   ;;  %s1173_s13 = sshll.u32 %s1531_s19, 7 }
  0x43   : > { %s1044_s9 = sshll.u32 %s197_s12, 6  ;;  %s210_s8 = scalar_lea.hbm %s1881_s0, %s1173_s13 }
  0x44   : > { %p1903_p4 = scmp.ne.s32.totalorder %s1895_s25, 0  ;;  %s201_s24 = scalar_lea.vmem [#allocation3], %s1044_s9 }
  0x45   : > { %s223_s27 = sshll.u32 %s201_s24, 4  ;;  %s1540_s10 = smov 256   ;;  %s224_s27 = int_to_ptr.vmem [resolvable:$true] %s223_s27 }
  0x46   : > { %s1322_s22 = scalar_select %p1903_p4, [#allocation0], [#allocation17] }
  0x47   : > { %1323 = sst [smem:[#allocation12]] (%p1903_p4), %s1540_s10  ;;  %s1541_s11 = smov 128  }
  0x48   : > { %s215_s7 = sld [smem:[%s1322_s22]]   ;;  %s1542_s1 = smov 2  }
  0x49   : > { %1324 = sst [smem:[#allocation12 + $0x1]] (%p1903_p4), %s1541_s11  ;;  %s1543_s23 = smov 64  }
  0x4a   : > { %1325 = sst [smem:[#allocation12 + $0x2]] (%p1903_p4), %s1542_s1  ;;  %s1544_s9 = smov 4  }
  0x4b   : > { %1326 = sst [smem:[#allocation12 + $0x3]] (%p1903_p4), %s1543_s23  ;;  %s198_s21 = scalar_lea.sflag [#allocation4], %s197_s12 }
  0x4c   : > { %1327 = sst [smem:[#allocation12 + $0x4]] (%p1903_p4), %s1543_s23  ;;  %s1545_s22 = smov [#allocation11]  }
  0x4d   : > { %1328 = sst [smem:[#allocation12 + $0x5]] (%p1903_p4), %s1544_s9 }
  0x4e   : > { %s1047_s13 = sshll.u32 %s215_s7, 26 }
  0x4f   : > { %s1048_s14 = sadd.s32 134217728, %s1047_s13 }
  0x50   : > { %1329 = dma.general (%p1903_p4), %s210_s8, 1024, %s224_s27, %s198_s21, %s1545_s22, [#allocation12], %s1048_s14, 0  }
  0x51 PF: > { %p1904_p5 = scmp.ne.s32.totalorder %s1900_s6, 0 }
  0x52   : > { %s1711_s1 = sand.u32 (!%p1904_p5), 1, %s1519_s16   ;;  %p1905_p8 = scmp.ne.s32.totalorder (!%p1904_p5), %s1897_s28, 0 }
  0x53   : > { %248 = sbr.rel (%p1904_p5) target bundleno = 408 (0x198), region = 32  ;;  %s1714_s23 = sshll.u32 (!%p1904_p5), %s1711_s1, 6 }
  0x54   : > { %s251_s24 = scalar_lea.sflag (!%p1904_p5), [#allocation4], %s1711_s1  ;;  %s254_s7 = scalar_lea.vmem (!%p1904_p5), [#allocation3], %s1714_s23 }
  0x5a   : > { %1498 = dma.done.wait (%p1905_p8), %s251_s24, 1024  }
  0x5b   : > { %1500 = vsyncadd (%p1905_p8), %s251_s24, 4294966272  ;;  %p1906_p9 = scmp.ne.s32.totalorder %s1896_s26, 0 }
  0x5d   : > { %1502 = dma.done.wait (%p1906_p9), [#allocation7], 256  }
  0x5e   : > { %1504 = vsyncadd (%p1906_p9), [#allocation7], 4294967040  ;;  %v1435_v0 = vld [vmem:[#allocation6] sm:$0xff]   ;;  %v1436_v1 = vld [vmem:[#allocation6 + $0x8] sm:$0xff]   ;;  %vm373_vm0 = vcmask 261120   ;;  %v1546_v25 = vmov 0.0  }
  0x5f   : > { %1296 = vmatprep.subr.bf16.mxu0 %v1435_v0  ;;  %v1437_v2 = vld [vmem:[%s254_s7] sm:$0xff]   ;;  %1316 = vmatprep.subr.bf16.mxu1 %v1435_v0  ;;  %v1438_v3 = vld [vmem:[%s254_s7 + $0x8] sm:$0xff]   ;;  %v1439_v4 = vld [vmem:[%s254_s7 + $0x10] sm:$0xff]   ;;  %s1752_s28 = scalar_lea.vmem [#allocation9], %s1714_s23  ;;  %s1760_s6 = scalar_lea.vmem [#allocation8], %s1714_s23 }
  0x60   : > { %1297 = vmatpush3.bf16.msra.mxu0 %v1435_v0  ;;  %1318 = vmatpush3.bf16.msra.mxu1 %v1435_v0  ;;  %v1441_v5 = vld [vmem:[%s254_s7 + $0x20] sm:$0xff]   ;;  %v1442_v6 = vld [vmem:[%s254_s7 + $0x28] sm:$0xff]   ;;  %v1443_v7 = vld [vmem:[%s254_s7 + $0x30] sm:$0xff]   ;;  %s809_s12 = scalar_lea.sflag [#allocation5], %s1711_s1  ;;  %s814_s8 = scalar_lea.sflag [#allocation10], %s1711_s1 }
  0x61   : > { %1298 = vmatprep.subr.bf16.mxu0 %v1436_v1  ;;  %1300 = vmatprep.mubr.msk.bf16.mxu0 %vm373_vm0, %v1437_v2  ;;  %v1440_v8 = vld [vmem:[%s254_s7 + $0x18] sm:$0xff]   ;;  %v1737_v10 = vld [vmem:[%s1883_s2] ss:$0 sm:$0xff] }
  0x62   : > { %1317 = vmatprep.subr.bf16.mxu1 %v1436_v1  ;;  %1308 = vmatprep.mubr.msk.bf16.mxu1 %vm373_vm0, %v1441_v5  ;;  %v1444_v9 = vld [vmem:[%s254_s7 + $0x38] sm:$0xff]  }
  0x64   : > { %1299 = vmatpush3.bf16.msra.mxu0 %v1436_v1  ;;  %1319 = vmatpush3.bf16.msra.mxu1 %v1436_v1 }
  0x67   : > { %1301 = vmatmul.mubr.msk.bf16.vlgmr.msra.gmra.mrb[0].mxu0 %vm373_vm0, %v1438_v3  ;;  %1309 = vmatmul.mubr.msk.bf16.vlgmr.msra.gmra.mrb[0].mxu1 %vm373_vm0, %v1442_v6 }
  0x68   : > { %1304 = vmatprep.mubr.msk.bf16.mxu0 %vm373_vm0, %v1439_v4  ;;  %1312 = vmatprep.mubr.msk.bf16.mxu1 %vm373_vm0, %v1443_v7 }
  0x6f   : > { %1305 = vmatmul.mubr.msk.bf16.gmra.mrb[4].mxu0 %vm373_vm0, %v1440_v8  ;;  %1313 = vmatmul.mubr.msk.bf16.gmra.mrb[4].mxu1 %vm373_vm0, %v1444_v9 }
 0x13a   : > { %v1302_v11 = vpop.f32.mrb[0].mxu0  ;;  %v1739_v12 = vpop.f32.mrb[0].mxu1 }
 0x13b   : > { %v432_v13 = vpop.f32.mrb[1].mxu0  ;;  %v1741_v14 = vpop.f32.mrb[1].mxu1 }
 0x13c   : > { %v508_v15 = vadd.f32 %v1737_v10, %v432_v13  ;;  %v1303_v16 = vpop.f32.mrb[2].mxu0  ;;  %v1744_v17 = vpop.f32.mrb[2].mxu1 }
 0x13d   : > { %v435_v18 = vpop.f32.mrb[3].mxu0  ;;  %v1746_v19 = vpop.f32.mrb[3].mxu1 }
 0x13e   : > { %vm510_vm1 = vcmp.gt.f32.partialorder %v508_v15, 1.0  ;;  %v1079_v20 = vadd.f32 -1.0, %v508_v15  ;;  %v509_v21 = vadd.f32 %v1737_v10, %v435_v18 }
 0x13f   : > { %v1073_v26 = vsel %vm510_vm1, 1.0, %v1546_v25 }
 0x140   : > { %v538_v22 = vsel %vm510_vm1, %v1079_v20, %v508_v15  ;;  %vm511_vm2 = vcmp.gt.f32.partialorder %v509_v21, 1.0  ;;  %v1214_v23 = vpack.c.bf16 %v509_v21, %v508_v15  ;;  %v1080_v24 = vadd.f32 -1.0, %v509_v21 }
 0x141   : > { %v540_v27 = vmul.f32 0.9, %v538_v22  ;;  %v1074_v28 = vsel %vm511_vm2, 1.0, %v1546_v25 }
 0x142   : > { %v1209_v29 = vpack.c.bf16 %v1074_v28, %v1073_v26  ;;  %1215 = vst [vmem:[%s1752_s28] sm:$0xff] %v1214_v23   ;;  %v539_v30 = vsel %vm511_vm2, %v1080_v24, %v509_v21  ;;  %v1306_v31 = vpop.f32.mrb[4].mxu0  ;;  %v1755_v32 = vpop.f32.mrb[4].mxu1 }
 0x143   : > { %v542_v33 = vadd.f32 %v1302_v11, %v540_v27  ;;  %v541_v34 = vmul.f32 0.9, %v539_v30  ;;  %v448_v35 = vpop.f32.mrb[5].mxu0  ;;  %v1757_v36 = vpop.f32.mrb[5].mxu1 }
 0x144   : > { %1210 = vst [vmem:[%s1760_s6] sm:$0xff] %v1209_v29   ;;  %v1307_v37 = vpop.f32.mrb[6].mxu0  ;;  %v1763_v38 = vpop.f32.mrb[6].mxu1 }
 0x145   : > { %v543_v39 = vadd.f32 %v1303_v16, %v541_v34  ;;  %v544_v40 = vadd.f32 %v1737_v10, %v542_v33  ;;  %v451_v41 = vpop.f32.mrb[7].mxu0  ;;  %v1766_v42 = vpop.f32.mrb[7].mxu1 }
 0x147   : > { %vm546_vm3 = vcmp.gt.f32.partialorder %v544_v40, 1.0  ;;  %v1091_v43 = vadd.f32 -1.0, %v544_v40  ;;  %v545_v44 = vadd.f32 %v1737_v10, %v543_v39 }
 0x148   : > { %v1081_v48 = vsel %vm546_vm3, 1.0, %v1546_v25 }
 0x149   : > { %v576_v45 = vsel %vm546_vm3, %v1091_v43, %v544_v40  ;;  %vm547_vm4 = vcmp.gt.f32.partialorder %v545_v44, 1.0  ;;  %v1222_v46 = vpack.c.bf16 %v545_v44, %v544_v40  ;;  %v1092_v47 = vadd.f32 -1.0, %v545_v44 }
 0x14a   : > { %v578_v49 = vmul.f32 0.9, %v576_v45  ;;  %v1082_v50 = vsel %vm547_vm4, 1.0, %v1546_v25 }
 0x14b   : > { %v1217_v51 = vpack.c.bf16 %v1082_v50, %v1081_v48  ;;  %1273 = vst [vmem:[%s1752_s28 + $0x8] sm:$0xff] %v1222_v46   ;;  %v577_v52 = vsel %vm547_vm4, %v1092_v47, %v545_v44 }
 0x14c   : > { %v580_v53 = vadd.f32 %v578_v49, %v448_v35  ;;  %v579_v54 = vmul.f32 0.9, %v577_v52 }
 0x14d   : > { %1272 = vst [vmem:[%s1760_s6 + $0x8] sm:$0xff] %v1217_v51  }
 0x14e   : > { %v582_v55 = vadd.f32 %v1737_v10, %v580_v53  ;;  %v581_v56 = vadd.f32 %v579_v54, %v451_v41 }
 0x150   : > { %vm584_vm5 = vcmp.gt.f32.partialorder %v582_v55, 1.0  ;;  %v1103_v57 = vadd.f32 -1.0, %v582_v55  ;;  %v583_v58 = vadd.f32 %v1737_v10, %v581_v56 }
 0x151   : > { %v1093_v62 = vsel %vm584_vm5, 1.0, %v1546_v25 }
 0x152   : > { %v614_v59 = vsel %vm584_vm5, %v1103_v57, %v582_v55  ;;  %vm585_vm6 = vcmp.gt.f32.partialorder %v583_v58, 1.0  ;;  %v1230_v60 = vpack.c.bf16 %v583_v58, %v582_v55  ;;  %v1104_v61 = vadd.f32 -1.0, %v583_v58 }
 0x153   : > { %v616_v63 = vmul.f32 0.9, %v614_v59  ;;  %v1094_v0 = vsel %vm585_vm6, 1.0, %v1546_v25 }
 0x154   : > { %v1225_v1 = vpack.c.bf16 %v1094_v0, %v1093_v62  ;;  %1275 = vst [vmem:[%s1752_s28 + $0x10] sm:$0xff] %v1230_v60   ;;  %v615_v2 = vsel %vm585_vm6, %v1104_v61, %v583_v58 }
 0x155   : > { %v617_v3 = vmul.f32 0.9, %v615_v2  ;;  %v618_v4 = vadd.f32 %v1306_v31, %v616_v63 }
 0x156   : > { %1274 = vst [vmem:[%s1760_s6 + $0x10] sm:$0xff] %v1225_v1  }
 0x157   : > { %v620_v5 = vadd.f32 %v1737_v10, %v618_v4  ;;  %v619_v6 = vadd.f32 %v1307_v37, %v617_v3 }
 0x159   : > { %vm622_vm7 = vcmp.gt.f32.partialorder %v620_v5, 1.0  ;;  %v1115_v7 = vadd.f32 -1.0, %v620_v5  ;;  %v621_v8 = vadd.f32 %v1737_v10, %v619_v6 }
 0x15a   : > { %v1105_v15 = vsel %vm622_vm7, 1.0, %v1546_v25 }
 0x15b   : > { %v652_v9 = vsel %vm622_vm7, %v1115_v7, %v620_v5  ;;  %vm623_vm8 = vcmp.gt.f32.partialorder %v621_v8, 1.0  ;;  %v1238_v11 = vpack.c.bf16 %v621_v8, %v620_v5  ;;  %v1116_v13 = vadd.f32 -1.0, %v621_v8 }
 0x15c   : > { %v654_v16 = vmul.f32 0.9, %v652_v9  ;;  %v1106_v18 = vsel %vm623_vm8, 1.0, %v1546_v25 }
 0x15d   : > { %v1233_v20 = vpack.c.bf16 %v1106_v18, %v1105_v15  ;;  %1277 = vst [vmem:[%s1752_s28 + $0x18] sm:$0xff] %v1238_v11   ;;  %v653_v21 = vsel %vm623_vm8, %v1116_v13, %v621_v8 }
 0x15e   : > { %v656_v22 = vadd.f32 %v654_v16, %v1741_v14  ;;  %v655_v23 = vmul.f32 0.9, %v653_v21 }
 0x15f   : > { %1276 = vst [vmem:[%s1760_s6 + $0x18] sm:$0xff] %v1233_v20  }
 0x160   : > { %v658_v24 = vadd.f32 %v1737_v10, %v656_v22  ;;  %v657_v26 = vadd.f32 %v655_v23, %v1746_v19 }
 0x162   : > { %vm660_vm9 = vcmp.gt.f32.partialorder %v658_v24, 1.0  ;;  %v1127_v27 = vadd.f32 -1.0, %v658_v24  ;;  %v659_v28 = vadd.f32 %v1737_v10, %v657_v26 }
 0x163   : > { %v1117_v33 = vsel %vm660_vm9, 1.0, %v1546_v25 }
 0x164   : > { %v690_v29 = vsel %vm660_vm9, %v1127_v27, %v658_v24  ;;  %vm661_vm10 = vcmp.gt.f32.partialorder %v659_v28, 1.0  ;;  %v1246_v30 = vpack.c.bf16 %v659_v28, %v658_v24  ;;  %v1128_v31 = vadd.f32 -1.0, %v659_v28 }
 0x165   : > { %v692_v34 = vmul.f32 0.9, %v690_v29  ;;  %v1118_v14 = vsel %vm661_vm10, 1.0, %v1546_v25 }
 0x166   : > { %v1241_v35 = vpack.c.bf16 %v1118_v14, %v1117_v33  ;;  %1279 = vst [vmem:[%s1752_s28 + $0x20] sm:$0xff] %v1246_v30   ;;  %v691_v37 = vsel %vm661_vm10, %v1128_v31, %v659_v28 }
 0x167   : > { %v693_v39 = vmul.f32 0.9, %v691_v37  ;;  %v694_v19 = vadd.f32 %v1739_v12, %v692_v34 }
 0x168   : > { %1278 = vst [vmem:[%s1760_s6 + $0x20] sm:$0xff] %v1241_v35  }
 0x169   : > { %v696_v40 = vadd.f32 %v1737_v10, %v694_v19  ;;  %v695_v41 = vadd.f32 %v1744_v17, %v693_v39 }
 0x16b   : > { %vm698_vm11 = vcmp.gt.f32.partialorder %v696_v40, 1.0  ;;  %v1139_v43 = vadd.f32 -1.0, %v696_v40  ;;  %v697_v44 = vadd.f32 %v1737_v10, %v695_v41 }
 0x16c   : > { %v1129_v48 = vsel %vm698_vm11, 1.0, %v1546_v25 }
 0x16d   : > { %v728_v45 = vsel %vm698_vm11, %v1139_v43, %v696_v40  ;;  %vm699_vm12 = vcmp.gt.f32.partialorder %v697_v44, 1.0  ;;  %v1254_v46 = vpack.c.bf16 %v697_v44, %v696_v40  ;;  %v1140_v47 = vadd.f32 -1.0, %v697_v44 }
 0x16e   : > { %v730_v49 = vmul.f32 0.9, %v728_v45  ;;  %v1130_v50 = vsel %vm699_vm12, 1.0, %v1546_v25 }
 0x16f   : > { %v1249_v12 = vpack.c.bf16 %v1130_v50, %v1129_v48  ;;  %1281 = vst [vmem:[%s1752_s28 + $0x28] sm:$0xff] %v1254_v46   ;;  %v729_v51 = vsel %vm699_vm12, %v1140_v47, %v697_v44 }
 0x170   : > { %v732_v52 = vadd.f32 %v730_v49, %v1757_v36  ;;  %v731_v17 = vmul.f32 0.9, %v729_v51 }
 0x171   : > { %1280 = vst [vmem:[%s1760_s6 + $0x28] sm:$0xff] %v1249_v12  }
 0x172   : > { %v734_v53 = vadd.f32 %v1737_v10, %v732_v52  ;;  %v733_v54 = vadd.f32 %v731_v17, %v1766_v42 }
 0x174   : > { %vm736_vm13 = vcmp.gt.f32.partialorder %v734_v53, 1.0  ;;  %v1151_v55 = vadd.f32 -1.0, %v734_v53  ;;  %v735_v56 = vadd.f32 %v1737_v10, %v733_v54 }
 0x175   : > { %v1141_v60 = vsel %vm736_vm13, 1.0, %v1546_v25 }
 0x176   : > { %v766_v57 = vsel %vm736_vm13, %v1151_v55, %v734_v53  ;;  %vm737_vm14 = vcmp.gt.f32.partialorder %v735_v56, 1.0  ;;  %v1262_v58 = vpack.c.bf16 %v735_v56, %v734_v53  ;;  %v1152_v59 = vadd.f32 -1.0, %v735_v56 }
 0x177   : > { %v768_v61 = vmul.f32 0.9, %v766_v57  ;;  %v1142_v36 = vsel %vm737_vm14, 1.0, %v1546_v25 }
 0x178   : > { %v1257_v62 = vpack.c.bf16 %v1142_v36, %v1141_v60  ;;  %1283 = vst [vmem:[%s1752_s28 + $0x30] sm:$0xff] %v1262_v58   ;;  %v767_v42 = vsel %vm737_vm14, %v1152_v59, %v735_v56 }
 0x179   : > { %v770_v63 = vadd.f32 %v1755_v32, %v768_v61  ;;  %v769_v0 = vmul.f32 0.9, %v767_v42 }
 0x17a   : > { %1282 = vst [vmem:[%s1760_s6 + $0x30] sm:$0xff] %v1257_v62  }
 0x17b   : > { %v772_v1 = vadd.f32 %v1737_v10, %v770_v63  ;;  %v771_v2 = vadd.f32 %v1763_v38, %v769_v0 }
 0x17d   : > { %vm774_vm15 = vcmp.gt.f32.partialorder %v772_v1, 1.0  ;;  %v773_v3 = vadd.f32 %v1737_v10, %v771_v2 }
 0x17e   : > { %v1153_v5 = vsel %vm774_vm15, 1.0, %v1546_v25 }
 0x17f   : > { %vm775_vm0 = vcmp.gt.f32.partialorder %v773_v3, 1.0  ;;  %v1270_v4 = vpack.c.bf16 %v773_v3, %v772_v1 }
 0x180   : > { %v1154_v6 = vsel %vm775_vm0, 1.0, %v1546_v25 }
 0x181   : > { %v1265_v7 = vpack.c.bf16 %v1154_v6, %v1153_v5  ;;  %1285 = vst [vmem:[%s1752_s28 + $0x38] sm:$0xff] %v1270_v4  }
 0x183   : > { %1284 = vst [vmem:[%s1760_s6 + $0x38] sm:$0xff] %v1265_v7  }
 0x184   : > { %s1206_s27 = sshll.u32 %s1527_s18, 7  ;;  %s846_s10 = sshll.u32 %s1760_s6, 4  ;;  %s847_s10 = int_to_ptr.vmem [resolvable:$true] %s846_s10 }
 0x185   : > { %s829_s9 = scalar_lea.hbm %s1884_s3, %s1206_s27  ;;  %s1547_s14 = smov 128  }
 0x186   : > { %p1907_p11 = scmp.ne.s32.totalorder %s1898_s29, 0  ;;  %s1548_s21 = smov 256  }
 0x187   : > { %s1549_s22 = smov 2   ;;  %s1550_s23 = smov 64  }
 0x188   : > { %1333 = sst [smem:[#allocation14]] (%p1907_p11), %s1547_s14  ;;  %s1551_s18 = smov 4  }
 0x189   : > { %1334 = sst [smem:[#allocation14 + $0x1]] (%p1907_p11), %s1548_s21  ;;  %s1552_s24 = smov [#allocation13]  }
 0x18a   : > { %1335 = sst [smem:[#allocation14 + $0x2]] (%p1907_p11), %s1549_s22  ;;  %s1553_s7 = smov 0  }
 0x18b   : > { %1336 = sst [smem:[#allocation14 + $0x3]] (%p1907_p11), %s1550_s23 }
 0x18c   : > { %1337 = sst [smem:[#allocation14 + $0x4]] (%p1907_p11), %s1550_s23 }
 0x18d   : > { %1338 = sst [smem:[#allocation14 + $0x5]] (%p1907_p11), %s1551_s18 }
 0x18e   : > { %1339 = dma.general (%p1907_p11), %s847_s10, 1024, %s829_s9, %s809_s12, %s1552_s24, [#allocation14], %s1553_s7, 0  }
 0x18f   : > { %s877_s6 = scalar_lea.hbm %s1885_s4, %s1206_s27  ;;  %s894_s11 = sshll.u32 %s1752_s28, 4  ;;  %s895_s11 = int_to_ptr.vmem [resolvable:$true] %s894_s11 }
 0x190   : > { %s1554_s13 = smov 128   ;;  %s1555_s14 = smov 256  }
 0x191   : > { %1340 = sst [smem:[#allocation16]] (%p1907_p11), %s1554_s13  ;;  %s1556_s12 = smov 2  }
 0x192   : > { %1341 = sst [smem:[#allocation16 + $0x1]] (%p1907_p11), %s1555_s14  ;;  %s1557_s10 = smov 64  }
 0x193   : > { %1342 = sst [smem:[#allocation16 + $0x2]] (%p1907_p11), %s1556_s12  ;;  %s1558_s9 = smov 4  }
 0x194   : > { %1343 = sst [smem:[#allocation16 + $0x3]] (%p1907_p11), %s1557_s10  ;;  %s1559_s27 = smov [#allocation15]  }
 0x195   : > { %1344 = sst [smem:[#allocation16 + $0x4]] (%p1907_p11), %s1557_s10  ;;  %s1560_s28 = smov 0  }
 0x196   : > { %1345 = sst [smem:[#allocation16 + $0x5]] (%p1907_p11), %s1558_s9 }
 0x197   : > { %1346 = dma.general (%p1907_p11), %s895_s11, 1024, %s877_s6, %s814_s8, %s1559_s27, [#allocation16], %s1560_s28, 0  }
 0x198 PF: > { %s922_s21 = sand.u32 1, %s1515_s15   ;;  %p1908_p0 = scmp.ne.s32.totalorder %s1899_s5, 0 }
 0x199   : > { %s923_s22 = scalar_lea.sflag [#allocation5], %s922_s21 }
 0x19a   : > { %p1354_p2 = pnand %p1043_p3, %p1908_p0 }
 0x19c   : > { %1506 = dma.done.wait (!%p1354_p2), %s923_s22, 1024  }
 0x19d   : > { %1508 = vsyncadd (!%p1354_p2), %s923_s22, 4294966272  ;;  %s932_s23 = scalar_lea.sflag [#allocation10], %s922_s21 }
 0x19e   : > { %1510 = dma.done.wait (!%p1354_p2), %s932_s23, 1024  }
 0x19f   : > { %1512 = vsyncadd (!%p1354_p2), %s932_s23, 4294966272  ;;  %s25_s20 = sadd.s32 1, %s1535_s20   ;;  %s1909_s29 = sld [smem:[#allocation22_spill]] }
 0x1a0   : > { %p22_p6 = scmp.ge.s32.totalorder %s25_s20, 4   ;;  %s1910_s15 = smov %s1519_s16 }
 0x1a1   : > { %s1911_s16 = smov %s1523_s17  ;;  %s1912_s17 = smov %s1648_s30 }
 0x1a2   : > { %s1913_s18 = smov %s1531_s19  ;;  %24 = sbr.rel (!%p22_p6) target bundleno = 11 (0xb), region = 131 }
 0x1a5   : > { %s1914_s19 = smov %s1909_s29 }
 0x1a9   :  { %937 = vsyncpa [#allocation4], 1 }
 0x1aa   :  { %939 = vsyncpa [#allocation4 + $0x1], 1 }
 0x1ab   :  { %940 = vsyncpa [#allocation7], 1 }
 0x1ac   :  { %941 = vsyncpa [#allocation5], 1 }
 0x1ad   :  { %943 = vsyncpa [#allocation5 + $0x1], 1 }
 0x1ae   :  { %944 = vsyncpa [#allocation10], 1 }
 0x1af   :  { %946 = vsyncpa [#allocation10 + $0x1], 1 }

</bundles_post_ra>
